<compile_context>
chip_gen: v5e
topology: v5e:2x2
jax: 0.10.0
libtpu: 0.0.40
codegen_flags: <defaults>
</compile_context>

<pallas_src>
import functools

import jax
import jax.numpy as jnp
from jax import lax
from jax.experimental import pallas as pl
from jax.experimental.pallas import tpu as pltpu

LANES = 128          # vreg lane width
CHUNK_ROWS = 512     # in-kernel compute sub-tile (rows of 128 pixels)
MIN_GRID_STEPS = 8   # keep both v7x TensorCores fed / amortize step overhead


def _ds_kernel(x_ref, wb_ref, bb_ref, wd_ref, bd_ref, o_ref, *,
               num_classes, c_in, eps, chunk, n_chunks, tail):
    # x_ref : VMEM (1, C_in, TR, 128)   lane-dense pixel slab per channel
    # wb_ref: SMEM (C, C_in)            backbone 1x1-conv weight
    # bb_ref: SMEM (C,)                 backbone bias
    # wd_ref: SMEM (C, C)               dirichlet_linear weight (out x in)
    # bd_ref: SMEM (C,)                 dirichlet_linear bias
    # o_ref : VMEM (1, C, TR, 128)
    C = num_classes

    def process(start, size):
        xs = [x_ref[0, ci, pl.ds(start, size), :].astype(jnp.float32)
              for ci in range(c_in)]

        # Backbone 1x1 conv: logits_c = sum_ci wb[c,ci] * x_ci + bb[c].
        # C / C_in are tiny -> unrolled VPU broadcast-FMAs with SMEM scalars.
        logits = []
        for c in range(C):
            acc = xs[0] * wb_ref[c, 0]
            for ci in range(1, c_in):
                acc = acc + xs[ci] * wb_ref[c, ci]
            logits.append(acc + bb_ref[c])

        # ln_c = log(probs_c + eps) without materializing probs:
        #   log(softmax_c + eps) = log(es_c + eps * s) - log(s)
        if C == 1:
            ln = [jnp.log(jax.nn.sigmoid(logits[0]) + eps)]
        else:
            m = logits[0]
            for c in range(1, C):
                m = jnp.maximum(m, logits[c])
            es = [jnp.exp(logits[c] - m) for c in range(C)]
            s = es[0]
            for c in range(1, C):
                s = s + es[c]
            log_s = jnp.log(s)
            ln = [jnp.log(es[c] + eps * s) - log_s for c in range(C)]

        # Dirichlet linear: ds_c = sum_c' wd[c,c'] * ln_c' + bd[c]
        for c in range(C):
            acc = ln[0] * wd_ref[c, 0]
            for cp in range(1, C):
                acc = acc + ln[cp] * wd_ref[c, cp]
            o_ref[0, c, pl.ds(start, size), :] = (acc + bd_ref[c]).astype(o_ref.dtype)

    def body(j, carry):
        process(pl.multiple_of(j * chunk, chunk), chunk)
        return carry

    lax.fori_loop(0, n_chunks, body, 0, unroll=True)
    if tail > 0:
        process(n_chunks * chunk, tail)


def _vmem_budget_bytes():
    """Per-generation scoped-VMEM budget (~48 MiB v7x, ~96 MiB v5e/v6e)."""
    try:
        cap = int(pltpu.get_tpu_info().vmem_capacity_bytes)
    except Exception:
        cap = 64 << 20          # conservative: assume v7x-sized VMEM
    cap = max(cap, 32 << 20)
    return min(int(cap * 0.75), 100 << 20)


def _pick_row_tile(rows, n_images, tr_cap):
    """Row tile: respect the VMEM byte budget, provide >= MIN_GRID_STEPS grid
    steps when possible, keep the (8,128) block constraint and clean chunking."""
    n_tiles = pl.cdiv(rows, max(tr_cap, 8))
    while (n_images * n_tiles < MIN_GRID_STEPS
           and pl.cdiv(rows, n_tiles + 1) >= 8):
        n_tiles += 1
    if n_tiles <= 1:
        return rows                       # one full block per image (always legal)
    tr = pl.cdiv(rows, n_tiles)
    quantum = CHUNK_ROWS if tr >= CHUNK_ROWS else 8
    tr = pl.cdiv(tr, quantum) * quantum
    return min(tr, rows)


def ds_forward(x_nchw, wb, bb, wd, bd, *, eps=1e-8):
    """x_nchw: (N, C_in, H, W) float32.  Returns DS logits (N, C, H, W) float32."""
    N, C_in, H, W = x_nchw.shape
    C = wb.shape[0]                       # conv weight is (C_out, C_in, 1, 1)
    HW = H * W
    rows = pl.cdiv(HW, LANES)

    vmem_budget = _vmem_budget_bytes()
    # Double-buffered (input + output) row slabs get ~60% of the budget; the
    # rest is headroom for chunked compute temporaries + internal scratch.
    bytes_per_row = (C_in + C) * LANES * 4
    tr_cap = max(8, int(vmem_budget * 0.6) // (2 * bytes_per_row))

    tr = _pick_row_tile(rows, N, tr_cap)
    n_row_tiles = pl.cdiv(rows, tr)       # ragged last tile is masked by Pallas

    # In-kernel compute chunking over the tr rows of each DMA tile.
    if tr <= CHUNK_ROWS:
        chunk, n_chunks, tail = tr, 1, 0
    else:
        chunk = CHUNK_ROWS
        n_chunks, tail = divmod(tr, CHUNK_ROWS)

    # Pixels -> (rows, 128) lane-dense slab per channel; pure reshape unless
    # H*W is not a multiple of 128 (then a minimal pad, sliced off below).
    x3 = x_nchw.reshape(N, C_in, HW)
    HW128 = rows * LANES
    if HW128 != HW:
        x3 = jnp.pad(x3, ((0, 0), (0, 0), (0, HW128 - HW)))
    x4 = x3.reshape(N, C_in, rows, LANES)

    # Grid-invariant weights prepared once (reshape / cast outside the kernel).
    wb2 = wb.reshape(C, C_in).astype(jnp.float32)
    bb1 = bb.reshape(C).astype(jnp.float32)
    wd2 = wd.astype(jnp.float32)
    bd1 = bd.reshape(C).astype(jnp.float32)

    kernel = functools.partial(
        _ds_kernel, num_classes=C, c_in=C_in, eps=eps,
        chunk=chunk, n_chunks=n_chunks, tail=tail)
    smem_spec = pl.BlockSpec(memory_space=pltpu.MemorySpace.SMEM)

    out4 = pl.pallas_call(
        kernel,
        out_shape=jax.ShapeDtypeStruct((N, C, rows, LANES), jnp.float32),
        grid_spec=pltpu.PrefetchScalarGridSpec(
            num_scalar_prefetch=0,
            grid=(N, n_row_tiles),
            in_specs=[
                pl.BlockSpec((1, C_in, tr, LANES), lambda n, r: (n, 0, r, 0)),
                smem_spec,   # backbone 1x1-conv weight
                smem_spec,   # backbone bias
                smem_spec,   # dirichlet weight
                smem_spec,   # dirichlet bias
            ],
            out_specs=pl.BlockSpec((1, C, tr, LANES), lambda n, r: (n, 0, r, 0)),
        ),
        compiler_params=pltpu.CompilerParams(
            dimension_semantics=("parallel", "parallel"),
            vmem_limit_bytes=int(vmem_budget)),
    )(x4, wb2, bb1, wd2, bd1)

    out = out4.reshape(N, C, HW128)
    if HW128 != HW:
        out = out[:, :, :HW]
    return out.reshape(N, C, H, W)


def _ds_reference(x_nchw, wb, bb, wd, bd, eps=1e-8):
    """Pure-JAX reference mirroring the PyTorch forward."""
    N, C_in, H, W = x_nchw.shape
    C = wb.shape[0]
    x2d = jnp.transpose(x_nchw, (0, 2, 3, 1)).reshape(-1, C_in)
    logits = x2d @ wb.reshape(C, C_in).T + bb            # 1x1 conv backbone
    if C == 1:
        probs = jax.nn.sigmoid(logits)
    else:
        probs = jax.nn.softmax(logits, axis=-1)
    ln = jnp.log(probs + eps)
    ds = ln @ wd.T + bd
    return jnp.transpose(ds.reshape(N, H, W, C), (0, 3, 1, 2))


if __name__ == "__main__":
    key = jax.random.PRNGKey(0)
    N, C_in, H, W = 2, 4, 16, 16
    num_classes = 4                      # >1 -> softmax branch

    k_x, k_w, k_b = jax.random.split(key, 3)
    x = jax.random.normal(k_x, (N, C_in, H, W), dtype=jnp.float32)

    # Backbone: deterministic 1x1 conv weights.
    wb = jax.random.normal(k_w, (num_classes, C_in, 1, 1), dtype=jnp.float32) * 0.5
    bb = jax.random.normal(k_b, (num_classes,), dtype=jnp.float32) * 0.1

    # DS.weights_init(): identity weight, zero bias for dirichlet_linear.
    wd = jnp.eye(num_classes, dtype=jnp.float32)
    bd = jnp.zeros((num_classes,), dtype=jnp.float32)

    out = ds_forward(x, wb, bb, wd, bd, eps=1e-8)
    out = jax.block_until_ready(out)

    ref = _ds_reference(x, wb, bb, wd, bd, eps=1e-8)
    assert out.shape == (N, num_classes, H, W)
    assert jnp.allclose(out, ref, atol=1e-5, rtol=1e-5), "mismatch vs reference"

    print("KERNEL_OK")
</pallas_src>

<mosaic_0001>
module attributes {stable_mosaic.version = 11 : i64} {
  func.func @_ds_kernel(%arg0: i32, %arg1: i32, %arg2: memref<1x4x2x128xf32, #tpu.memory_space<vmem>>, %arg3: memref<4x4xf32, #tpu.memory_space<smem>>, %arg4: memref<4xf32, #tpu.memory_space<smem>>, %arg5: memref<4x4xf32, #tpu.memory_space<smem>>, %arg6: memref<4xf32, #tpu.memory_space<smem>>, %arg7: memref<1x4x2x128xf32, #tpu.memory_space<vmem>>) attributes {dimension_semantics = [#tpu.dimension_semantics<parallel>, #tpu.dimension_semantics<parallel>], iteration_bounds = array<i64: 2, 1>, scalar_prefetch = 0 : i64, scratch_operands = 0 : i64, tpu.core_type = #tpu.core_type<tc>, window_params = [{transform_indices = @transform_0, window_bounds = array<i64: 1, 4, 2, 128>}, {transform_indices = @transform_1, window_bounds = array<i64: 4, 4>}, {transform_indices = @transform_2, window_bounds = array<i64: 4>}, {transform_indices = @transform_3, window_bounds = array<i64: 4, 4>}, {transform_indices = @transform_4, window_bounds = array<i64: 4>}, {transform_indices = @transform_5, window_bounds = array<i64: 1, 4, 2, 128>}]} {
    %c0_i32 = arith.constant 0 : i32
    %c2_i32 = arith.constant 2 : i32
    %0 = arith.muli %c0_i32, %c2_i32 : i32
    %1 = tpu.assume_multiple %0, 2 : i32
    %c0 = arith.constant 0 : index
    %c0_0 = arith.constant 0 : index
    %2 = arith.index_cast %1 : i32 to index
    %c0_1 = arith.constant 0 : index
    %3 = vector.load %arg2[%c0, %c0_0, %2, %c0_1] : memref<1x4x2x128xf32, #tpu.memory_space<vmem>>, vector<1x1x2x128xf32>
    %4 = vector.shape_cast %3 : vector<1x1x2x128xf32> to vector<2x128xf32>
    %c0_2 = arith.constant 0 : index
    %c1 = arith.constant 1 : index
    %5 = arith.index_cast %1 : i32 to index
    %c0_3 = arith.constant 0 : index
    %6 = vector.load %arg2[%c0_2, %c1, %5, %c0_3] : memref<1x4x2x128xf32, #tpu.memory_space<vmem>>, vector<1x1x2x128xf32>
    %7 = vector.shape_cast %6 : vector<1x1x2x128xf32> to vector<2x128xf32>
    %c0_4 = arith.constant 0 : index
    %c2 = arith.constant 2 : index
    %8 = arith.index_cast %1 : i32 to index
    %c0_5 = arith.constant 0 : index
    %9 = vector.load %arg2[%c0_4, %c2, %8, %c0_5] : memref<1x4x2x128xf32, #tpu.memory_space<vmem>>, vector<1x1x2x128xf32>
    %10 = vector.shape_cast %9 : vector<1x1x2x128xf32> to vector<2x128xf32>
    %c0_6 = arith.constant 0 : index
    %c3 = arith.constant 3 : index
    %11 = arith.index_cast %1 : i32 to index
    %c0_7 = arith.constant 0 : index
    %12 = vector.load %arg2[%c0_6, %c3, %11, %c0_7] : memref<1x4x2x128xf32, #tpu.memory_space<vmem>>, vector<1x1x2x128xf32>
    %13 = vector.shape_cast %12 : vector<1x1x2x128xf32> to vector<2x128xf32>
    %c0_8 = arith.constant 0 : index
    %c0_9 = arith.constant 0 : index
    %14 = memref.load %arg3[%c0_8, %c0_9] : memref<4x4xf32, #tpu.memory_space<smem>>
    %15 = vector.broadcast %14 : f32 to vector<2x128xf32>
    %16 = arith.mulf %4, %15 : vector<2x128xf32>
    %c0_10 = arith.constant 0 : index
    %c1_11 = arith.constant 1 : index
    %17 = memref.load %arg3[%c0_10, %c1_11] : memref<4x4xf32, #tpu.memory_space<smem>>
    %18 = vector.broadcast %17 : f32 to vector<2x128xf32>
    %19 = arith.mulf %7, %18 : vector<2x128xf32>
    %20 = arith.addf %16, %19 : vector<2x128xf32>
    %c0_12 = arith.constant 0 : index
    %c2_13 = arith.constant 2 : index
    %21 = memref.load %arg3[%c0_12, %c2_13] : memref<4x4xf32, #tpu.memory_space<smem>>
    %22 = vector.broadcast %21 : f32 to vector<2x128xf32>
    %23 = arith.mulf %10, %22 : vector<2x128xf32>
    %24 = arith.addf %20, %23 : vector<2x128xf32>
    %c0_14 = arith.constant 0 : index
    %c3_15 = arith.constant 3 : index
    %25 = memref.load %arg3[%c0_14, %c3_15] : memref<4x4xf32, #tpu.memory_space<smem>>
    %26 = vector.broadcast %25 : f32 to vector<2x128xf32>
    %27 = arith.mulf %13, %26 : vector<2x128xf32>
    %28 = arith.addf %24, %27 : vector<2x128xf32>
    %c0_16 = arith.constant 0 : index
    %29 = memref.load %arg4[%c0_16] : memref<4xf32, #tpu.memory_space<smem>>
    %30 = vector.broadcast %29 : f32 to vector<2x128xf32>
    %31 = arith.addf %28, %30 : vector<2x128xf32>
    %c1_17 = arith.constant 1 : index
    %c0_18 = arith.constant 0 : index
    %32 = memref.load %arg3[%c1_17, %c0_18] : memref<4x4xf32, #tpu.memory_space<smem>>
    %33 = vector.broadcast %32 : f32 to vector<2x128xf32>
    %34 = arith.mulf %4, %33 : vector<2x128xf32>
    %c1_19 = arith.constant 1 : index
    %c1_20 = arith.constant 1 : index
    %35 = memref.load %arg3[%c1_19, %c1_20] : memref<4x4xf32, #tpu.memory_space<smem>>
    %36 = vector.broadcast %35 : f32 to vector<2x128xf32>
    %37 = arith.mulf %7, %36 : vector<2x128xf32>
    %38 = arith.addf %34, %37 : vector<2x128xf32>
    %c1_21 = arith.constant 1 : index
    %c2_22 = arith.constant 2 : index
    %39 = memref.load %arg3[%c1_21, %c2_22] : memref<4x4xf32, #tpu.memory_space<smem>>
    %40 = vector.broadcast %39 : f32 to vector<2x128xf32>
    %41 = arith.mulf %10, %40 : vector<2x128xf32>
    %42 = arith.addf %38, %41 : vector<2x128xf32>
    %c1_23 = arith.constant 1 : index
    %c3_24 = arith.constant 3 : index
    %43 = memref.load %arg3[%c1_23, %c3_24] : memref<4x4xf32, #tpu.memory_space<smem>>
    %44 = vector.broadcast %43 : f32 to vector<2x128xf32>
    %45 = arith.mulf %13, %44 : vector<2x128xf32>
    %46 = arith.addf %42, %45 : vector<2x128xf32>
    %c1_25 = arith.constant 1 : index
    %47 = memref.load %arg4[%c1_25] : memref<4xf32, #tpu.memory_space<smem>>
    %48 = vector.broadcast %47 : f32 to vector<2x128xf32>
    %49 = arith.addf %46, %48 : vector<2x128xf32>
    %c2_26 = arith.constant 2 : index
    %c0_27 = arith.constant 0 : index
    %50 = memref.load %arg3[%c2_26, %c0_27] : memref<4x4xf32, #tpu.memory_space<smem>>
    %51 = vector.broadcast %50 : f32 to vector<2x128xf32>
    %52 = arith.mulf %4, %51 : vector<2x128xf32>
    %c2_28 = arith.constant 2 : index
    %c1_29 = arith.constant 1 : index
    %53 = memref.load %arg3[%c2_28, %c1_29] : memref<4x4xf32, #tpu.memory_space<smem>>
    %54 = vector.broadcast %53 : f32 to vector<2x128xf32>
    %55 = arith.mulf %7, %54 : vector<2x128xf32>
    %56 = arith.addf %52, %55 : vector<2x128xf32>
    %c2_30 = arith.constant 2 : index
    %c2_31 = arith.constant 2 : index
    %57 = memref.load %arg3[%c2_30, %c2_31] : memref<4x4xf32, #tpu.memory_space<smem>>
    %58 = vector.broadcast %57 : f32 to vector<2x128xf32>
    %59 = arith.mulf %10, %58 : vector<2x128xf32>
    %60 = arith.addf %56, %59 : vector<2x128xf32>
    %c2_32 = arith.constant 2 : index
    %c3_33 = arith.constant 3 : index
    %61 = memref.load %arg3[%c2_32, %c3_33] : memref<4x4xf32, #tpu.memory_space<smem>>
    %62 = vector.broadcast %61 : f32 to vector<2x128xf32>
    %63 = arith.mulf %13, %62 : vector<2x128xf32>
    %64 = arith.addf %60, %63 : vector<2x128xf32>
    %c2_34 = arith.constant 2 : index
    %65 = memref.load %arg4[%c2_34] : memref<4xf32, #tpu.memory_space<smem>>
    %66 = vector.broadcast %65 : f32 to vector<2x128xf32>
    %67 = arith.addf %64, %66 : vector<2x128xf32>
    %c3_35 = arith.constant 3 : index
    %c0_36 = arith.constant 0 : index
    %68 = memref.load %arg3[%c3_35, %c0_36] : memref<4x4xf32, #tpu.memory_space<smem>>
    %69 = vector.broadcast %68 : f32 to vector<2x128xf32>
    %70 = arith.mulf %4, %69 : vector<2x128xf32>
    %c3_37 = arith.constant 3 : index
    %c1_38 = arith.constant 1 : index
    %71 = memref.load %arg3[%c3_37, %c1_38] : memref<4x4xf32, #tpu.memory_space<smem>>
    %72 = vector.broadcast %71 : f32 to vector<2x128xf32>
    %73 = arith.mulf %7, %72 : vector<2x128xf32>
    %74 = arith.addf %70, %73 : vector<2x128xf32>
    %c3_39 = arith.constant 3 : index
    %c2_40 = arith.constant 2 : index
    %75 = memref.load %arg3[%c3_39, %c2_40] : memref<4x4xf32, #tpu.memory_space<smem>>
    %76 = vector.broadcast %75 : f32 to vector<2x128xf32>
    %77 = arith.mulf %10, %76 : vector<2x128xf32>
    %78 = arith.addf %74, %77 : vector<2x128xf32>
    %c3_41 = arith.constant 3 : index
    %c3_42 = arith.constant 3 : index
    %79 = memref.load %arg3[%c3_41, %c3_42] : memref<4x4xf32, #tpu.memory_space<smem>>
    %80 = vector.broadcast %79 : f32 to vector<2x128xf32>
    %81 = arith.mulf %13, %80 : vector<2x128xf32>
    %82 = arith.addf %78, %81 : vector<2x128xf32>
    %c3_43 = arith.constant 3 : index
    %83 = memref.load %arg4[%c3_43] : memref<4xf32, #tpu.memory_space<smem>>
    %84 = vector.broadcast %83 : f32 to vector<2x128xf32>
    %85 = arith.addf %82, %84 : vector<2x128xf32>
    %86 = arith.maximumf %31, %49 : vector<2x128xf32>
    %87 = arith.maximumf %86, %67 : vector<2x128xf32>
    %88 = arith.maximumf %87, %85 : vector<2x128xf32>
    %89 = arith.subf %31, %88 : vector<2x128xf32>
    %90 = math.exp %89 : vector<2x128xf32>
    %91 = arith.subf %49, %88 : vector<2x128xf32>
    %92 = math.exp %91 : vector<2x128xf32>
    %93 = arith.subf %67, %88 : vector<2x128xf32>
    %94 = math.exp %93 : vector<2x128xf32>
    %95 = arith.subf %85, %88 : vector<2x128xf32>
    %96 = math.exp %95 : vector<2x128xf32>
    %97 = arith.addf %90, %92 : vector<2x128xf32>
    %98 = arith.addf %97, %94 : vector<2x128xf32>
    %99 = arith.addf %98, %96 : vector<2x128xf32>
    %100 = math.log %99 : vector<2x128xf32>
    %cst = arith.constant 9.99999993E-9 : f32
    %101 = vector.broadcast %cst : f32 to vector<2x128xf32>
    %102 = arith.mulf %101, %99 : vector<2x128xf32>
    %103 = arith.addf %90, %102 : vector<2x128xf32>
    %104 = math.log %103 : vector<2x128xf32>
    %105 = arith.subf %104, %100 : vector<2x128xf32>
    %cst_44 = arith.constant 9.99999993E-9 : f32
    %106 = vector.broadcast %cst_44 : f32 to vector<2x128xf32>
    %107 = arith.mulf %106, %99 : vector<2x128xf32>
    %108 = arith.addf %92, %107 : vector<2x128xf32>
    %109 = math.log %108 : vector<2x128xf32>
    %110 = arith.subf %109, %100 : vector<2x128xf32>
    %cst_45 = arith.constant 9.99999993E-9 : f32
    %111 = vector.broadcast %cst_45 : f32 to vector<2x128xf32>
    %112 = arith.mulf %111, %99 : vector<2x128xf32>
    %113 = arith.addf %94, %112 : vector<2x128xf32>
    %114 = math.log %113 : vector<2x128xf32>
    %115 = arith.subf %114, %100 : vector<2x128xf32>
    %cst_46 = arith.constant 9.99999993E-9 : f32
    %116 = vector.broadcast %cst_46 : f32 to vector<2x128xf32>
    %117 = arith.mulf %116, %99 : vector<2x128xf32>
    %118 = arith.addf %96, %117 : vector<2x128xf32>
    %119 = math.log %118 : vector<2x128xf32>
    %120 = arith.subf %119, %100 : vector<2x128xf32>
    %c0_47 = arith.constant 0 : index
    %c0_48 = arith.constant 0 : index
    %121 = memref.load %arg5[%c0_47, %c0_48] : memref<4x4xf32, #tpu.memory_space<smem>>
    %122 = vector.broadcast %121 : f32 to vector<2x128xf32>
    %123 = arith.mulf %105, %122 : vector<2x128xf32>
    %c0_49 = arith.constant 0 : index
    %c1_50 = arith.constant 1 : index
    %124 = memref.load %arg5[%c0_49, %c1_50] : memref<4x4xf32, #tpu.memory_space<smem>>
    %125 = vector.broadcast %124 : f32 to vector<2x128xf32>
    %126 = arith.mulf %110, %125 : vector<2x128xf32>
    %127 = arith.addf %123, %126 : vector<2x128xf32>
    %c0_51 = arith.constant 0 : index
    %c2_52 = arith.constant 2 : index
    %128 = memref.load %arg5[%c0_51, %c2_52] : memref<4x4xf32, #tpu.memory_space<smem>>
    %129 = vector.broadcast %128 : f32 to vector<2x128xf32>
    %130 = arith.mulf %115, %129 : vector<2x128xf32>
    %131 = arith.addf %127, %130 : vector<2x128xf32>
    %c0_53 = arith.constant 0 : index
    %c3_54 = arith.constant 3 : index
    %132 = memref.load %arg5[%c0_53, %c3_54] : memref<4x4xf32, #tpu.memory_space<smem>>
    %133 = vector.broadcast %132 : f32 to vector<2x128xf32>
    %134 = arith.mulf %120, %133 : vector<2x128xf32>
    %135 = arith.addf %131, %134 : vector<2x128xf32>
    %c0_55 = arith.constant 0 : index
    %136 = memref.load %arg6[%c0_55] : memref<4xf32, #tpu.memory_space<smem>>
    %137 = vector.broadcast %136 : f32 to vector<2x128xf32>
    %138 = arith.addf %135, %137 : vector<2x128xf32>
    %c0_56 = arith.constant 0 : index
    %c0_57 = arith.constant 0 : index
    %139 = arith.index_cast %1 : i32 to index
    %c0_58 = arith.constant 0 : index
    %140 = vector.load %arg7[%c0_56, %c0_57, %139, %c0_58] : memref<1x4x2x128xf32, #tpu.memory_space<vmem>>, vector<1x1x2x128xf32>
    %141 = vector.shape_cast %140 : vector<1x1x2x128xf32> to vector<2x128xf32>
    %142 = vector.shape_cast %138 : vector<2x128xf32> to vector<1x1x2x128xf32>
    tpu.vector_store %arg7[%c0_56, %c0_57, %139, %c0_58], %142 {strides = array<i32>} : memref<1x4x2x128xf32, #tpu.memory_space<vmem>>, vector<1x1x2x128xf32>,
    %c1_59 = arith.constant 1 : index
    %c0_60 = arith.constant 0 : index
    %143 = memref.load %arg5[%c1_59, %c0_60] : memref<4x4xf32, #tpu.memory_space<smem>>
    %144 = vector.broadcast %143 : f32 to vector<2x128xf32>
    %145 = arith.mulf %105, %144 : vector<2x128xf32>
    %c1_61 = arith.constant 1 : index
    %c1_62 = arith.constant 1 : index
    %146 = memref.load %arg5[%c1_61, %c1_62] : memref<4x4xf32, #tpu.memory_space<smem>>
    %147 = vector.broadcast %146 : f32 to vector<2x128xf32>
    %148 = arith.mulf %110, %147 : vector<2x128xf32>
    %149 = arith.addf %145, %148 : vector<2x128xf32>
    %c1_63 = arith.constant 1 : index
    %c2_64 = arith.constant 2 : index
    %150 = memref.load %arg5[%c1_63, %c2_64] : memref<4x4xf32, #tpu.memory_space<smem>>
    %151 = vector.broadcast %150 : f32 to vector<2x128xf32>
    %152 = arith.mulf %115, %151 : vector<2x128xf32>
    %153 = arith.addf %149, %152 : vector<2x128xf32>
    %c1_65 = arith.constant 1 : index
    %c3_66 = arith.constant 3 : index
    %154 = memref.load %arg5[%c1_65, %c3_66] : memref<4x4xf32, #tpu.memory_space<smem>>
    %155 = vector.broadcast %154 : f32 to vector<2x128xf32>
    %156 = arith.mulf %120, %155 : vector<2x128xf32>
    %157 = arith.addf %153, %156 : vector<2x128xf32>
    %c1_67 = arith.constant 1 : index
    %158 = memref.load %arg6[%c1_67] : memref<4xf32, #tpu.memory_space<smem>>
    %159 = vector.broadcast %158 : f32 to vector<2x128xf32>
    %160 = arith.addf %157, %159 : vector<2x128xf32>
    %c0_68 = arith.constant 0 : index
    %c1_69 = arith.constant 1 : index
    %161 = arith.index_cast %1 : i32 to index
    %c0_70 = arith.constant 0 : index
    %162 = vector.load %arg7[%c0_68, %c1_69, %161, %c0_70] : memref<1x4x2x128xf32, #tpu.memory_space<vmem>>, vector<1x1x2x128xf32>
    %163 = vector.shape_cast %162 : vector<1x1x2x128xf32> to vector<2x128xf32>
    %164 = vector.shape_cast %160 : vector<2x128xf32> to vector<1x1x2x128xf32>
    tpu.vector_store %arg7[%c0_68, %c1_69, %161, %c0_70], %164 {strides = array<i32>} : memref<1x4x2x128xf32, #tpu.memory_space<vmem>>, vector<1x1x2x128xf32>,
    %c2_71 = arith.constant 2 : index
    %c0_72 = arith.constant 0 : index
    %165 = memref.load %arg5[%c2_71, %c0_72] : memref<4x4xf32, #tpu.memory_space<smem>>
    %166 = vector.broadcast %165 : f32 to vector<2x128xf32>
    %167 = arith.mulf %105, %166 : vector<2x128xf32>
    %c2_73 = arith.constant 2 : index
    %c1_74 = arith.constant 1 : index
    %168 = memref.load %arg5[%c2_73, %c1_74] : memref<4x4xf32, #tpu.memory_space<smem>>
    %169 = vector.broadcast %168 : f32 to vector<2x128xf32>
    %170 = arith.mulf %110, %169 : vector<2x128xf32>
    %171 = arith.addf %167, %170 : vector<2x128xf32>
    %c2_75 = arith.constant 2 : index
    %c2_76 = arith.constant 2 : index
    %172 = memref.load %arg5[%c2_75, %c2_76] : memref<4x4xf32, #tpu.memory_space<smem>>
    %173 = vector.broadcast %172 : f32 to vector<2x128xf32>
    %174 = arith.mulf %115, %173 : vector<2x128xf32>
    %175 = arith.addf %171, %174 : vector<2x128xf32>
    %c2_77 = arith.constant 2 : index
    %c3_78 = arith.constant 3 : index
    %176 = memref.load %arg5[%c2_77, %c3_78] : memref<4x4xf32, #tpu.memory_space<smem>>
    %177 = vector.broadcast %176 : f32 to vector<2x128xf32>
    %178 = arith.mulf %120, %177 : vector<2x128xf32>
    %179 = arith.addf %175, %178 : vector<2x128xf32>
    %c2_79 = arith.constant 2 : index
    %180 = memref.load %arg6[%c2_79] : memref<4xf32, #tpu.memory_space<smem>>
    %181 = vector.broadcast %180 : f32 to vector<2x128xf32>
    %182 = arith.addf %179, %181 : vector<2x128xf32>
    %c0_80 = arith.constant 0 : index
    %c2_81 = arith.constant 2 : index
    %183 = arith.index_cast %1 : i32 to index
    %c0_82 = arith.constant 0 : index
    %184 = vector.load %arg7[%c0_80, %c2_81, %183, %c0_82] : memref<1x4x2x128xf32, #tpu.memory_space<vmem>>, vector<1x1x2x128xf32>
    %185 = vector.shape_cast %184 : vector<1x1x2x128xf32> to vector<2x128xf32>
    %186 = vector.shape_cast %182 : vector<2x128xf32> to vector<1x1x2x128xf32>
    tpu.vector_store %arg7[%c0_80, %c2_81, %183, %c0_82], %186 {strides = array<i32>} : memref<1x4x2x128xf32, #tpu.memory_space<vmem>>, vector<1x1x2x128xf32>,
    %c3_83 = arith.constant 3 : index
    %c0_84 = arith.constant 0 : index
    %187 = memref.load %arg5[%c3_83, %c0_84] : memref<4x4xf32, #tpu.memory_space<smem>>
    %188 = vector.broadcast %187 : f32 to vector<2x128xf32>
    %189 = arith.mulf %105, %188 : vector<2x128xf32>
    %c3_85 = arith.constant 3 : index
    %c1_86 = arith.constant 1 : index
    %190 = memref.load %arg5[%c3_85, %c1_86] : memref<4x4xf32, #tpu.memory_space<smem>>
    %191 = vector.broadcast %190 : f32 to vector<2x128xf32>
    %192 = arith.mulf %110, %191 : vector<2x128xf32>
    %193 = arith.addf %189, %192 : vector<2x128xf32>
    %c3_87 = arith.constant 3 : index
    %c2_88 = arith.constant 2 : index
    %194 = memref.load %arg5[%c3_87, %c2_88] : memref<4x4xf32, #tpu.memory_space<smem>>
    %195 = vector.broadcast %194 : f32 to vector<2x128xf32>
    %196 = arith.mulf %115, %195 : vector<2x128xf32>
    %197 = arith.addf %193, %196 : vector<2x128xf32>
    %c3_89 = arith.constant 3 : index
    %c3_90 = arith.constant 3 : index
    %198 = memref.load %arg5[%c3_89, %c3_90] : memref<4x4xf32, #tpu.memory_space<smem>>
    %199 = vector.broadcast %198 : f32 to vector<2x128xf32>
    %200 = arith.mulf %120, %199 : vector<2x128xf32>
    %201 = arith.addf %197, %200 : vector<2x128xf32>
    %c3_91 = arith.constant 3 : index
    %202 = memref.load %arg6[%c3_91] : memref<4xf32, #tpu.memory_space<smem>>
    %203 = vector.broadcast %202 : f32 to vector<2x128xf32>
    %204 = arith.addf %201, %203 : vector<2x128xf32>
    %c0_92 = arith.constant 0 : index
    %c3_93 = arith.constant 3 : index
    %205 = arith.index_cast %1 : i32 to index
    %c0_94 = arith.constant 0 : index
    %206 = vector.load %arg7[%c0_92, %c3_93, %205, %c0_94] : memref<1x4x2x128xf32, #tpu.memory_space<vmem>>, vector<1x1x2x128xf32>
    %207 = vector.shape_cast %206 : vector<1x1x2x128xf32> to vector<2x128xf32>
    %208 = vector.shape_cast %204 : vector<2x128xf32> to vector<1x1x2x128xf32>
    tpu.vector_store %arg7[%c0_92, %c3_93, %205, %c0_94], %208 {strides = array<i32>} : memref<1x4x2x128xf32, #tpu.memory_space<vmem>>, vector<1x1x2x128xf32>,
    %c1_i32 = arith.constant 1 : i32
    return
  }
  func.func @transform_0(%arg0: i32, %arg1: i32) -> (i32, i32, i32, i32) {
    %c0_i32 = arith.constant 0 : i32
    %c0_i32_0 = arith.constant 0 : i32
    %c0_i32_1 = arith.constant 0 : i32
    return %arg0, %c0_i32, %arg1, %c0_i32_0 : i32, i32, i32, i32
  }
  func.func @transform_1(%arg0: i32, %arg1: i32) -> (i32, i32) {
    %c0_i32 = arith.constant 0 : i32
    %c0_i32_0 = arith.constant 0 : i32
    %c0_i32_1 = arith.constant 0 : i32
    return %c0_i32, %c0_i32_0 : i32, i32
  }
  func.func @transform_2(%arg0: i32, %arg1: i32) -> i32 {
    %c0_i32 = arith.constant 0 : i32
    %c0_i32_0 = arith.constant 0 : i32
    return %c0_i32 : i32
  }
  func.func @transform_3(%arg0: i32, %arg1: i32) -> (i32, i32) {
    %c0_i32 = arith.constant 0 : i32
    %c0_i32_0 = arith.constant 0 : i32
    %c0_i32_1 = arith.constant 0 : i32
    return %c0_i32, %c0_i32_0 : i32, i32
  }
  func.func @transform_4(%arg0: i32, %arg1: i32) -> i32 {
    %c0_i32 = arith.constant 0 : i32
    %c0_i32_0 = arith.constant 0 : i32
    return %c0_i32 : i32
  }
  func.func @transform_5(%arg0: i32, %arg1: i32) -> (i32, i32, i32, i32) {
    %c0_i32 = arith.constant 0 : i32
    %c0_i32_0 = arith.constant 0 : i32
    %c0_i32_1 = arith.constant 0 : i32
    return %arg0, %c0_i32, %arg1, %c0_i32_0 : i32, i32, i32, i32
  }
}

</mosaic_0001>

<bundles_post_ra>
// kernel: tpu_custom_call.1
= control target key start
LH: loop header
LB: loop body
LE: loop exit
PB: predicated region body
PF: predicated region fallthrough
CT: control target
= control target key end

     0   :  { %s1336_s0 = inlined_call_operand.hbm [shape: f32[2,4,2,128], index: 0, kind: input, shape index: {}]   ;;  %s1337_s1 = inlined_call_operand.hbm [shape: f32[4,4], index: 1, kind: input, shape index: {}]   ;;  %s1338_s2 = inlined_call_operand.vmem [shape: f32[4], index: 2, kind: input, shape index: {}]   ;;  %s1339_s3 = inlined_call_operand.hbm [shape: f32[4,4], index: 3, kind: input, shape index: {}]   ;;  %s1340_s4 = inlined_call_operand.vmem [shape: f32[4], index: 4, kind: input, shape index: {}]   ;;  %s1341_s5 = inlined_call_operand.hbm [shape: f32[2,4,2,128], index: 5, kind: output, shape index: {}]  }
   0x1   :  { %1342 = sst [smem:[#allocation20_spill]] %s1337_s1 }
   0x2   :  { %1343 = sst [smem:[#allocation21_spill]] %s1338_s2 }
   0x3   :  { %1344 = sst [smem:[#allocation22_spill]] %s1339_s3 }
   0x4   :  { %10 = vsyncpa [#allocation3], 0 }
   0x5   :  { %12 = vsyncpa [#allocation3 + $0x1], 0 }
   0x6   :  { %13 = vsyncpa [#allocation5], 0 }
   0x7   :  { %14 = vsyncpa [#allocation6], 0 }
   0x8   :  { %15 = vsyncpa [#allocation10], 0 }
   0x9   :  { %16 = vsyncpa [#allocation12], 0 }
   0xa   :  { %17 = vsyncpa [#allocation4], 0 }
   0xb   :  { %19 = vsyncpa [#allocation4 + $0x1], 0  ;;  %s1085_s18 = smov 0   ;;  %s1087_s19 = smov 0  }
   0xc   :  { %s1089_s20 = smov 0   ;;  %s1091_s21 = smov 0  }
   0xd   :  { %s1093_s22 = smov 0   ;;  %s1095_s23 = smov 0  }
   0xe LB: > { %s665_s24 = sadd.s32 4294967295, %s1045_s23   ;;  %s666_s25 = sadd.s32 4294967294, %s1045_s23   ;;  %s1045_s23 = sphi %s1095_s23, %s25_s23   ;;  %s1041_s22 = sphi %s1093_s22, %s1359_s22   ;;  %s1037_s21 = sphi %s1091_s21, %s1358_s21   ;;  %s1033_s20 = sphi %s1089_s20, %s1357_s20   ;;  %s1029_s19 = sphi %s1087_s19, %s1356_s19   ;;  %s1025_s18 = sphi %s1085_s18, %s1355_s18  }
   0xf   : > { %p59_p0 = scmp.ne.s32.totalorder %s1029_s19, %s1025_s18  ;;  %p1119_p1 = scmp.eq.s32.totalorder %s665_s24, 0 }
  0x10   : > { %p1123_p2 = scmp.eq.s32.totalorder %s665_s24, 1  ;;  %p175_p3 = scmp.eq.s32.totalorder %s666_s25, 1 }
  0x11   : > { %p1129_p4 = por %p1119_p1, %p59_p0  ;;  %p667_p5 = scmp.ge.s32.totalorder %s1045_s23, 1 }
  0x12   : > { %p1134_p6 = por %p175_p3, %p59_p0  ;;  %p182_p7 = scmp.lt.s32.totalorder %s1045_s23, 3 }
  0x13   : > { %s1349_s1 = sld [smem:[#allocation20_spill]]  ;;  %p672_p9 = scmp.ge.s32.totalorder %s1045_s23, 2 }
  0x14   : > { %p1142_p8 = pnand %p667_p5, %p182_p7  ;;  %s1351_s2 = sld [smem:[#allocation21_spill]] }
  0x15   : > { %s1352_s3 = sld [smem:[#allocation22_spill]]  ;;  %s224_s17 = sshll.u32 %s1340_s4, 4  ;;  %s225_s17 = int_to_ptr.vmem [resolvable:$true] %s224_s17 }
  0x16   : > { %p752_p10 = pneg %p1142_p8  ;;  %s1047_s24 = smov [#allocation7]  }
  0x17   : > { %s1048_s25 = smov [#allocation8]   ;;  %s1049_s30 = smov [#allocation9]  }
  0x18   : > { %p753_p11 = pnand %p752_p10, %p1119_p1  ;;  %s1050_s6 = smov [#allocation11]  }
  0x19   : > { %s194_s7 = sshll.u32 %s1349_s1, 4  ;;  %s37_s9 = sadd.s32 1, %s1041_s22  ;;  %s195_s7 = int_to_ptr.hbm [resolvable:$true] %s194_s7 }
  0x1a   : > { %s204_s11 = sshll.u32 %s1351_s2, 4  ;;  %s46_s10 = sadd.s32 1, %s1033_s20  ;;  %s205_s11 = int_to_ptr.vmem [resolvable:$true] %s204_s11 }
  0x1b   : > { %s214_s14 = sshll.u32 %s1352_s3, 4  ;;  %p39_p12 = scmp.ge.s32.totalorder %s37_s9, 2  ;;  %s215_s14 = int_to_ptr.hbm [resolvable:$true] %s214_s14 }
  0x1c   : > { %755 = dma.hbm_to_smem (!%p753_p11), %s195_s7, 64, %s1047_s24, [#allocation5]  }
  0x1d   : > { %758 = dma.vmem_to_smem (!%p753_p11), %s205_s11, 16, %s1048_s25, [#allocation6]  }
  0x1e   : > { %761 = dma.hbm_to_smem (!%p753_p11), %s215_s14, 64, %s1049_s30, [#allocation10]  }
  0x1f   : > { %764 = dma.vmem_to_smem (!%p753_p11), %s225_s17, 16, %s1050_s6, [#allocation12]  }
  0x20   : > { %p53_p13 = scmp.ne.s32.totalorder %s1033_s20, %s1029_s19  ;;  %p54_p0 = scmp.eq.s32.totalorder %s1045_s23, 0 }
  0x21   : > { %p777_p3 = scmp.lt.s32.totalorder %s1045_s23, 2  ;;  %s1361_s9 = smov (%p39_p12, %s37_s9), 0 }
  0x22   : > { %p1168_p5 = por %p54_p0, %p53_p13  ;;  %p1174_p7 = por %p1123_p2, %p53_p13 }
  0x23   : > { %s41_s12 = ssub.s32 %s1041_s22, %s1361_s9  ;;  %s235_s13 = sand.u32 1, %s1033_s20  }
  0x24   : > { %p44_p10 = scmp.eq.s32.totalorder %s41_s12, 0  ;;  %s673_s14 = sshll.u32 %s235_s13, 3 }
  0x25   : > { %s730_s15 = sshll.u32 %s1041_s22, 3  ;;  %s239_s6 = scalar_lea.vmem [#allocation2], %s673_s14 }
  0x26   : > { %s1183_s16 = scalar_select %p44_p10, %s1033_s20, %s46_s10  }
  0x27   : > { %s245_s25 = scalar_lea.hbm %s1336_s0, %s730_s15  ;;  %s248_s1 = sshll.u32 %s239_s6, 4  ;;  %s249_s1 = int_to_ptr.vmem [resolvable:$true] %s248_s1 }
  0x28   : > { %s246_s30 = sshll.u32 %s245_s25, 4  ;;  %p766_p2 = pnand %p777_p3, %p1168_p5  ;;  %s247_s30 = int_to_ptr.hbm [resolvable:$true] %s246_s30 }
  0x29   : > { %s236_s27 = scalar_lea.sflag [#allocation3], %s235_s13  ;;  %s1051_s2 = smov 32  }
  0x2a   : > { %s1052_s3 = smov 2   ;;  %260 = sbr.rel (%p1142_p8) target bundleno = 144 (0x90), region = 40 }
  0x2b   : > { %768 = dma.hbm_to_vmem [thread:$0]  (!%p766_p2), %s247_s30, 128, %s249_s1, %s236_s27, %s1051_s2, %s1051_s2, %s1052_s3  }
  0x2c   : > { %s1195_s10 = sand.u32 (!%p1142_p8), 1, %s1029_s19  }
  0x2d   : > { %s677_s12 = sshll.u32 (!%p1142_p8), %s1195_s10, 3  ;;  %s263_s14 = scalar_lea.sflag (!%p1142_p8), [#allocation3], %s1195_s10 }
  0x2e   : > { %s1201_s7 = scalar_lea.vmem (!%p1142_p8), [#allocation2], %s677_s12 }
  0x2f   : > { %1000 = dma.done.wait (%p1129_p4), %s263_s14, 128  }
  0x30   : > { %1002 = vsyncadd (%p1129_p4), %s263_s14, 4294967168 }
  0x31   : > { %1004 = dma.done.wait (%p1119_p1), [#allocation5], 64  }
  0x32   : > { %1006 = vsyncadd (%p1119_p1), [#allocation5], 4294967232 }
  0x33   : > { %1008 = dma.done.wait (%p1119_p1), [#allocation6], 16  }
  0x34   : > { %1010 = vsyncadd (%p1119_p1), [#allocation6], 4294967280 }
  0x35   : > { %1012 = dma.done.wait (%p1119_p1), [#allocation10], 64  }
  0x36   : > { %1014 = vsyncadd (%p1119_p1), [#allocation10], 4294967232 }
  0x37   : > { %1016 = dma.done.wait (%p1119_p1), [#allocation12], 16  }
  0x38   : > { %1018 = vsyncadd (%p1119_p1), [#allocation12], 4294967280 }
  0x39   : > { %292 = sfence }
  0x3a   : > { %s325_s1 = sld [smem:[#allocation7]]  ;;  %v315_v0 = vld [vmem:[%s1201_s7] sm:$0x3]  ;;  %v683_v1 = vld [vmem:[%s1201_s7 + $0x2] sm:$0x3] }
  0x3b   : > { %s686_s2 = sld [smem:[#allocation7 + $0x1]]  ;;  %v684_v2 = vld [vmem:[%s1201_s7 + $0x4] sm:$0x3]  ;;  %v685_v9 = vld [vmem:[%s1201_s7 + $0x6] sm:$0x3] }
  0x3c   : > { %s687_s3 = sld [smem:[#allocation7 + $0x2]] }
  0x3d   : > { %s688_s28 = sld [smem:[#allocation7 + $0x3]] }
  0x3e   : > { %s1224_s8 = sld [smem:[#allocation8]] }
  0x3f   : > { %s689_s13 = sld [smem:[#allocation7 + $0x80]] }
  0x40   : > { %v326_v3 = vstv %s325_s1  ;;  %s690_s15 = sld [smem:[#allocation7 + $0x81]] }
  0x41   : > { %v327_v4 = vmul.f32 %v326_v3, %v315_v0  ;;  %v329_v5 = vstv %s686_s2  ;;  %s691_s26 = sld [smem:[#allocation7 + $0x82]] }
  0x42   : > { %v330_v6 = vmul.f32 %v683_v1, %v329_v5  ;;  %v333_v7 = vstv %s687_s3  ;;  %s692_s17 = sld [smem:[#allocation7 + $0x83]] }
  0x43   : > { %v334_v8 = vmul.f32 %v684_v2, %v333_v7  ;;  %s1228_s24 = sld [smem:[#allocation8 + $0x1]]  ;;  %v337_v11 = vstv %s688_s28 }
  0x44   : > { %v331_v10 = vadd.f32 %v330_v6, %v327_v4  ;;  %s694_s25 = sld [smem:[#allocation7 + $0x100]]  ;;  %v338_v16 = vmul.f32 %v685_v9, %v337_v11  ;;  %v341_v28 = vstv %s1224_s8 }
  0x45   : > { %v344_v12 = vstv %s689_s13  ;;  %s695_s30 = sld [smem:[#allocation7 + $0x101]] }
  0x46   : > { %v345_v13 = vmul.f32 %v344_v12, %v315_v0  ;;  %v347_v14 = vstv %s690_s15  ;;  %s696_s6 = sld [smem:[#allocation7 + $0x102]]  ;;  %v335_v15 = vadd.f32 %v334_v8, %v331_v10 }
  0x47   : > { %v348_v17 = vmul.f32 %v683_v1, %v347_v14  ;;  %v351_v18 = vstv %s691_s26  ;;  %s697_s27 = sld [smem:[#allocation7 + $0x103]] }
  0x48   : > { %v352_v19 = vmul.f32 %v684_v2, %v351_v18  ;;  %v355_v20 = vstv %s692_s17  ;;  %s1231_s14 = sld [smem:[#allocation8 + $0x2]]  ;;  %v339_v24 = vadd.f32 %v338_v16, %v335_v15 }
  0x49   : > { %v349_v21 = vadd.f32 %v348_v17, %v345_v13  ;;  %v356_v22 = vmul.f32 %v685_v9, %v355_v20  ;;  %s699_s7 = sld [smem:[#allocation7 + $0x180]]  ;;  %v359_v29 = vstv %s1228_s24 }
  0x4a   : > { %v362_v23 = vstv %s694_s25  ;;  %s700_s1 = sld [smem:[#allocation7 + $0x181]]  ;;  %v342_v37 = vadd.f32 %v341_v28, %v339_v24 }
  0x4b   : > { %v353_v25 = vadd.f32 %v352_v19, %v349_v21  ;;  %v363_v26 = vmul.f32 %v362_v23, %v315_v0  ;;  %v365_v27 = vstv %s695_s30  ;;  %s701_s2 = sld [smem:[#allocation7 + $0x182]] }
  0x4c   : > { %v366_v30 = vmul.f32 %v683_v1, %v365_v27  ;;  %v369_v31 = vstv %s696_s6  ;;  %s702_s3 = sld [smem:[#allocation7 + $0x183]] }
  0x4d   : > { %v357_v32 = vadd.f32 %v356_v22, %v353_v25  ;;  %v370_v33 = vmul.f32 %v684_v2, %v369_v31  ;;  %v373_v34 = vstv %s697_s27  ;;  %s703_s28 = sld [smem:[#allocation8 + $0x3]] }
  0x4e   : > { %v367_v35 = vadd.f32 %v366_v30, %v363_v26  ;;  %v374_v36 = vmul.f32 %v685_v9, %v373_v34  ;;  %v377_v43 = vstv %s1231_s14  ;;  %s1236_s8 = sld [smem:[#allocation9]] }
  0x4f   : > { %v360_v38 = vadd.f32 %v359_v29, %v357_v32  ;;  %v380_v39 = vstv %s699_s7  ;;  %s1238_s13 = sld [smem:[#allocation9 + $0x1]] }
  0x50   : > { %v371_v40 = vadd.f32 %v370_v33, %v367_v35  ;;  %v381_v41 = vmul.f32 %v380_v39, %v315_v0  ;;  %v383_v42 = vstv %s700_s1  ;;  %s1240_s15 = sld [smem:[#allocation9 + $0x2]] }
  0x51   : > { %v384_v44 = vmul.f32 %v683_v1, %v383_v42  ;;  %v387_v45 = vstv %s701_s2  ;;  %v397_v51 = vmax.f32 %v342_v37, %v360_v38  ;;  %s1242_s26 = sld [smem:[#allocation9 + $0x3]] }
  0x52   : > { %v375_v46 = vadd.f32 %v374_v36, %v371_v40  ;;  %v388_v47 = vmul.f32 %v684_v2, %v387_v45  ;;  %v391_v48 = vstv %s702_s3  ;;  %s1244_s17 = sld [smem:[#allocation9 + $0x80]] }
  0x53   : > { %v385_v49 = vadd.f32 %v384_v44, %v381_v41  ;;  %v392_v50 = vmul.f32 %v685_v9, %v391_v48  ;;  %v395_v54 = vstv %s703_s28  ;;  %s1246_s24 = sld [smem:[#allocation9 + $0x81]] }
  0x54   : > { %v378_v52 = vadd.f32 %v377_v43, %v375_v46  ;;  %s1248_s25 = sld [smem:[#allocation9 + $0x82]]  ;;  %v435_v17 = vstv %s1236_s8 }
  0x55   : > { %v389_v53 = vadd.f32 %v388_v47, %v385_v49  ;;  %s1250_s30 = sld [smem:[#allocation9 + $0x83]]  ;;  %v438_v18 = vstv %s1238_s13 }
  0x56   : > { %v398_v56 = vmax.f32 %v397_v51, %v378_v52  ;;  %s1252_s6 = sld [smem:[#allocation9 + $0x100]]  ;;  %v442_v20 = vstv %s1240_s15 }
  0x57   : > { %v393_v55 = vadd.f32 %v392_v50, %v389_v53  ;;  %s1254_s27 = sld [smem:[#allocation9 + $0x101]]  ;;  %v446_v31 = vstv %s1242_s26 }
  0x58   : > { %s1256_s14 = sld [smem:[#allocation9 + $0x102]]  ;;  %v454_v21 = vstv %s1244_s17  ;;  %s731_s17 = sshll.u32 %s1037_s21, 3 }
  0x59   : > { %v396_v57 = vadd.f32 %v395_v54, %v393_v55  ;;  %s1258_s7 = sld [smem:[#allocation9 + $0x103]]  ;;  %v457_v22 = vstv %s1246_s24  ;;  %s314_s21 = scalar_lea.vmem [#allocation13], %s677_s12 }
  0x5a   : > { %s1260_s1 = sld [smem:[#allocation9 + $0x180]]  ;;  %v461_v26 = vstv %s1248_s25 }
  0x5b   : > { %v399_v58 = vmax.f32 %v398_v56, %v396_v57  ;;  %s1262_s2 = sld [smem:[#allocation9 + $0x181]]  ;;  %v465_v32 = vstv %s1250_s30  ;;  %s526_s30 = scalar_lea.hbm %s1341_s5, %s731_s17 }
  0x5c   : > { %s1264_s3 = sld [smem:[#allocation9 + $0x182]]  ;;  %v474_v23 = vstv %s1252_s6  ;;  %s527_s6 = sshll.u32 %s314_s21, 4  ;;  %s528_s6 = int_to_ptr.vmem [resolvable:$true] %s527_s6 }
  0x5d   : > { %v400_v59 = vsub.f32 %v342_v37, %v399_v58  ;;  %v403_v60 = vsub.f32 %v360_v38, %v399_v58  ;;  %v406_v61 = vsub.f32 %v378_v52, %v399_v58  ;;  %v409_v62 = vsub.f32 %v396_v57, %v399_v58  ;;  %s1266_s28 = sld [smem:[#allocation9 + $0x183]] }
  0x5e   : > { %v477_v27 = vstv %s1254_s27  ;;  %v481_v28 = vstv %s1256_s14  ;;  %s1278_s8 = sld [smem:[#allocation11]]  ;;  %s529_s27 = sshll.u32 %s526_s30, 4  ;;  %s530_s27 = int_to_ptr.hbm [resolvable:$true] %s529_s27 }
  0x5f   : > { %v401_v63 = vmul.f32 1.442695, %v400_v59  ;;  %v404_v0 = vmul.f32 1.442695, %v403_v60  ;;  %v407_v1 = vmul.f32 1.442695, %v406_v61  ;;  %v485_v33 = vstv %s1258_s7 }
  0x60   : > { %v410_v3 = vmul.f32 1.442695, %v409_v62  ;;  %s1282_s13 = sld [smem:[#allocation11 + $0x1]]  ;;  %v494_v37 = vstv %s1260_s1  ;;  %s514_s14 = scalar_lea.sflag [#allocation4], %s1195_s10 }
  0x61   : > { %839 = vpow2.f32 %v401_v63  ;;  %v497_v38 = vstv %s1262_s2  ;;  %s1286_s15 = sld [smem:[#allocation11 + $0x2]]  ;;  %s961_s12 = sshra.s32 %s530_s27, 4  ;;  %s962_s12 = int_to_ptr.hbm [resolvable:$true] %s961_s12 }
  0x62   : > { %841 = vpow2.f32 %v404_v0  ;;  %v501_v41 = vstv %s1264_s3  ;;  %s1290_s26 = sld [smem:[#allocation11 + $0x3]]  ;;  %s963_s7 = scalar_lea.hbm %s962_s12, 8 }
  0x63   : > { %843 = vpow2.f32 %v407_v1  ;;  %v505_v42 = vstv %s1266_s28  ;;  %p964_p1 = scmp.ne.s32.totalorder %s962_s12, %s963_s7  ;;  %s967_s3 = scalar_lea.hbm %s1341_s5, 16 }
  0x64   : > { %845 = vpow2.f32 %v410_v3  ;;  %v450_v0 = vstv %s1278_s8  ;;  %p968_p11 = scmp.lt.s32.totalorder %s962_s12, %s1341_s5  ;;  %p969_p12 = scmp.lt.s32.totalorder %s967_s3, %s963_s7 }
  0x65   : > { %p965_p4 = pnand %p964_p1, %p1174_p7 }
  0x66   : > { %v469_v3 = vstv %s1282_s13  ;;  %p970_p13 = por %p969_p12, %p968_p11 }
  0x67   : > { %v840_v2 = vpop.eup %839  ;;  %p966_p8 = pneg %p965_p4 }
  0x68   : > { %v842_v4 = vpop.eup %841 }
  0x69   : > { %v844_v5 = vpop.eup %843  ;;  %v412_v6 = vadd.f32 %v842_v4, %v840_v2  ;;  %p971_p0 = pnand %p970_p13, %p966_p8 }
  0x6a   : > { %v846_v7 = vpop.eup %845 }
  0x6b   : > { %v413_v8 = vadd.f32 %v844_v5, %v412_v6 }
  0x6d   : > { %v414_v9 = vadd.f32 %v846_v7, %v413_v8  ;;  %v489_v8 = vstv %s1286_s15 }
  0x6f   : > { %847 = vlog2.f32 %v414_v9  ;;  %v417_v10 = vmul.f32 1e-08, %v414_v9 }
  0x71   : > { %v418_v11 = vadd.f32 %v840_v2, %v417_v10  ;;  %v422_v12 = vadd.f32 %v842_v4, %v417_v10  ;;  %v426_v13 = vadd.f32 %v844_v5, %v417_v10  ;;  %v430_v14 = vadd.f32 %v846_v7, %v417_v10 }
  0x73   : > { %849 = vlog2.f32 %v418_v11 }
  0x74   : > { %851 = vlog2.f32 %v422_v12 }
  0x75   : > { %v848_v15 = vpop.eup %847  ;;  %853 = vlog2.f32 %v426_v13  ;;  %v509_v13 = vstv %s1290_s26 }
  0x76   : > { %855 = vlog2.f32 %v430_v14  ;;  %v416_v16 = vmul.f32 0.6931472, %v848_v15 }
  0x79   : > { %v850_v19 = vpop.eup %849 }
  0x7a   : > { %v852_v24 = vpop.eup %851  ;;  %v420_v25 = vmul.f32 0.6931472, %v850_v19 }
  0x7b   : > { %v854_v29 = vpop.eup %853  ;;  %v424_v30 = vmul.f32 0.6931472, %v852_v24 }
  0x7c   : > { %v856_v34 = vpop.eup %855  ;;  %v421_v35 = vsub.f32 %v420_v25, %v416_v16  ;;  %v428_v36 = vmul.f32 0.6931472, %v854_v29 }
  0x7d   : > { %v425_v39 = vsub.f32 %v424_v30, %v416_v16  ;;  %v432_v40 = vmul.f32 0.6931472, %v856_v34 }
  0x7e   : > { %v429_v43 = vsub.f32 %v428_v36, %v416_v16  ;;  %v436_v44 = vmul.f32 %v435_v17, %v421_v35  ;;  %v455_v45 = vmul.f32 %v454_v21, %v421_v35  ;;  %v475_v46 = vmul.f32 %v474_v23, %v421_v35 }
  0x7f   : > { %v433_v47 = vsub.f32 %v432_v40, %v416_v16  ;;  %v439_v48 = vmul.f32 %v438_v18, %v425_v39  ;;  %v458_v49 = vmul.f32 %v457_v22, %v425_v39  ;;  %v478_v50 = vmul.f32 %v477_v27, %v425_v39 }
  0x80   : > { %v443_v51 = vmul.f32 %v442_v20, %v429_v43  ;;  %v462_v52 = vmul.f32 %v461_v26, %v429_v43  ;;  %v482_v53 = vmul.f32 %v481_v28, %v429_v43  ;;  %v495_v54 = vmul.f32 %v494_v37, %v421_v35 }
  0x81   : > { %v440_v55 = vadd.f32 %v439_v48, %v436_v44  ;;  %v447_v56 = vmul.f32 %v446_v31, %v433_v47  ;;  %v459_v57 = vadd.f32 %v458_v49, %v455_v45  ;;  %v466_v58 = vmul.f32 %v465_v32, %v433_v47 }
  0x82   : > { %v479_v59 = vadd.f32 %v478_v50, %v475_v46  ;;  %v486_v60 = vmul.f32 %v485_v33, %v433_v47  ;;  %v498_v61 = vmul.f32 %v497_v38, %v425_v39  ;;  %v502_v62 = vmul.f32 %v501_v41, %v429_v43 }
  0x83   : > { %v444_v63 = vadd.f32 %v443_v51, %v440_v55  ;;  %v463_v1 = vadd.f32 %v462_v52, %v459_v57  ;;  %v506_v5 = vmul.f32 %v505_v42, %v433_v47 }
  0x84   : > { %v483_v2 = vadd.f32 %v482_v53, %v479_v59  ;;  %v499_v4 = vadd.f32 %v498_v61, %v495_v54 }
  0x85   : > { %v448_v6 = vadd.f32 %v447_v56, %v444_v63  ;;  %v467_v7 = vadd.f32 %v466_v58, %v463_v1 }
  0x86   : > { %v487_v9 = vadd.f32 %v486_v60, %v483_v2  ;;  %v503_v10 = vadd.f32 %v502_v62, %v499_v4 }
  0x87   : > { %v451_v11 = vadd.f32 %v450_v0, %v448_v6  ;;  %v470_v12 = vadd.f32 %v469_v3, %v467_v7 }
  0x88   : > { %v490_v14 = vadd.f32 %v489_v8, %v487_v9  ;;  %v507_v15 = vadd.f32 %v506_v5, %v503_v10 }
  0x89   : > { %452 = vst [vmem:[%s314_s21] sm:$0x3] %v451_v11 }
  0x8a   : > { %712 = vst [vmem:[%s314_s21 + $0x2] sm:$0x3] %v470_v12  ;;  %v510_v16 = vadd.f32 %v509_v13, %v507_v15 }
  0x8b   : > { %718 = vst [vmem:[%s314_s21 + $0x4] sm:$0x3] %v490_v14 }
  0x8c   : > { %724 = vst [vmem:[%s314_s21 + $0x6] sm:$0x3] %v510_v16 }
  0x8d   : > { %974 = shalt.err (!%p971_p0)
}
  0x8e   : > { %s1053_s10 = smov 32   ;;  %s1054_s13 = smov 2  }
  0x8f   : > { %750 = dma.vmem_to_hbm [thread:$0]  (%p1174_p7), %s528_s6, 128, %s530_s27, %s514_s14, %s1053_s10, %s1053_s10, %s1054_s13  }
  0x90 PF: > { %s544_s15 = sand.u32 1, %s1025_s18   ;;  %p770_p3 = pnand %p672_p9, %p1134_p6 }
  0x91   : > { %s545_s26 = scalar_lea.sflag [#allocation4], %s544_s15 }
  0x92   : > { %p771_p5 = pneg %p770_p3 }
  0x94   : > { %1020 = dma.done.wait (%p771_p5), %s545_s26, 128  }
  0x95   : > { %1022 = vsyncadd (%p771_p5), %s545_s26, 4294967168  ;;  %s25_s23 = sadd.s32 1, %s1045_s23   ;;  %s1355_s18 = smov %s1029_s19 }
  0x96   : > { %p22_p10 = scmp.ge.s32.totalorder %s25_s23, 4   ;;  %s1356_s19 = smov %s1033_s20 }
  0x97   : > { %s1357_s20 = smov %s1183_s16  ;;  %s1358_s21 = smov %s1041_s22 }
  0x98   : > { %s1359_s22 = smov %s1361_s9  ;;  %24 = sbr.rel (!%p22_p10) target bundleno = 14 (0xe), region = 109 }
  0x9d   :  { %551 = vsyncpa [#allocation3], 1 }
  0x9e   :  { %553 = vsyncpa [#allocation3 + $0x1], 1 }
  0x9f   :  { %554 = vsyncpa [#allocation4], 1 }
  0xa0   :  { %556 = vsyncpa [#allocation4 + $0x1], 1 }
  0xa1   :  { %557 = vsyncpa [#allocation5], 1 }
  0xa2   :  { %559 = vsyncpa [#allocation5 + $0x1], 1 }
  0xa3   :  { %560 = vsyncpa [#allocation10], 1 }
  0xa4   :  { %561 = vsyncpa [#allocation6], 1 }
  0xa5   :  { %563 = vsyncpa [#allocation6 + $0x1], 1 }
  0xa6   :  { %564 = vsyncpa [#allocation12], 1 }

</bundles_post_ra>
